<compile_context>
chip_gen: v6e
topology: v6e:2x2x1
jax: 0.10.0
libtpu: 0.0.40
codegen_flags: <defaults>
</compile_context>

<pallas_src>
import jax
import jax.numpy as jnp
from jax import lax
from jax.experimental import pallas as pl
from jax.experimental.pallas import tpu as pltpu


def client_net_kernel(x_ref, w_ref, b_ref, o_ref):
    # x_ref: (tm, K) f32, w_ref: (K, 128) bf16, b_ref: (1, 128) f32,
    # o_ref: (tm, 128) f32.
    x_bf = x_ref[...].astype(jnp.bfloat16)       # in-kernel cast (hides under DMA)
    y = lax.dot_general(
        x_bf,
        w_ref[...],
        dimension_numbers=(((1,), (0,)), ((), ())),   # (tm,K) x (K,128) -> (tm,128)
        preferred_element_type=jnp.float32,
    )
    o_ref[...] = jnp.maximum(y + b_ref[...], 0.0).astype(o_ref.dtype)


def prepare_client_net_params(weight, bias):
    """One-time parameter prep (hoisted out of the per-call path).

    weight : (128, n_dim) f32  (PyTorch nn.Linear 'out x in' convention)
    bias   : (128,) f32
    returns: (w_t_bf16 (n_dim, 128) bf16, bias2 (1, 128) f32)
    """
    out_features, n_dim = weight.shape
    w_t_bf16 = weight.T.astype(jnp.bfloat16)          # (K, 128), contraction leading
    bias2 = bias.reshape(1, out_features).astype(jnp.float32)
    return w_t_bf16, bias2


def client_net_forward(x, w_t_bf16, bias2):
    """relu(flatten(x) @ W^T + b) with pre-prepared (K,128) bf16 weight."""
    B = x.shape[0]
    x2 = x.reshape(B, -1)                              # torch.flatten(x, 1)
    K, N = w_t_bf16.shape
    assert x2.shape[1] == K, (x2.shape, w_t_bf16.shape)
    assert bias2.shape == (1, N)

    # Batch tiling: single whole-array block for small B (launch-bound case);
    # parallel batch grid for large B so v7x's two TensorCores are both used.
    if B >= 512 and B % 256 == 0:
        tm = 256
    else:
        tm = B
    grid = (B // tm,)

    bytes_accessed = (
        x2.size * x2.dtype.itemsize
        + w_t_bf16.size * w_t_bf16.dtype.itemsize
        + bias2.size * bias2.dtype.itemsize
        + B * N * 4
    )

    return pl.pallas_call(
        client_net_kernel,
        out_shape=jax.ShapeDtypeStruct((B, N), jnp.float32),
        grid=grid,
        in_specs=[
            pl.BlockSpec((tm, K), lambda i: (i, 0)),   # activations, batch-tiled
            pl.BlockSpec((K, N), lambda i: (0, 0)),    # weight, resident across grid
            pl.BlockSpec((1, N), lambda i: (0, 0)),    # bias, resident
        ],
        out_specs=pl.BlockSpec((tm, N), lambda i: (i, 0)),
        compiler_params=pltpu.CompilerParams(
            dimension_semantics=("parallel",),
        ),
        cost_estimate=pl.CostEstimate(
            flops=2 * B * K * N,
            transcendentals=0,
            bytes_accessed=bytes_accessed,
        ),
    )(x2, w_t_bf16, bias2)
    # TODO(synk): if n_dim grows past ~64K (v5e 16 MiB scoped VMEM) add a
    # K-tiled reduction grid with an f32 accumulator scratch.


if __name__ == "__main__":
    # Small demo shapes; n_dim = 4*16*16 = 1024 (128-aligned K).
    B, C, H, W = 8, 4, 16, 16
    n_dim = C * H * W

    key = jax.random.PRNGKey(0)
    kx, kw, kb = jax.random.split(key, 3)

    x = jax.random.normal(kx, (B, C, H, W), dtype=jnp.float32)
    # Deterministic parameter init (PyTorch-Linear-like uniform bound).
    bound = 1.0 / (n_dim ** 0.5)
    weight = jax.random.uniform(kw, (128, n_dim), minval=-bound, maxval=bound,
                                dtype=jnp.float32)
    bias = jax.random.uniform(kb, (128,), minval=-bound, maxval=bound,
                              dtype=jnp.float32)

    # One-time parameter preparation (hoisted out of the forward path).
    w_t_bf16, bias2 = prepare_client_net_params(weight, bias)

    out = jax.block_until_ready(client_net_forward(x, w_t_bf16, bias2))

    # Reference (plain JAX, f32) matching the PyTorch module semantics.
    ref = jnp.maximum(x.reshape(B, -1) @ weight.T + bias, 0.0)
    assert out.shape == (B, 128)
    # bf16 MXU operands with f32 accumulation -> loosened tolerance vs f32 ref.
    err = float(jnp.max(jnp.abs(out - ref)))
    assert jnp.allclose(out, ref, atol=2e-2, rtol=2e-2), f"max abs err {err}"

    print("KERNEL_OK")
</pallas_src>

<mosaic_0001>
module attributes {stable_mosaic.version = 11 : i64} {
  func.func @client_net_kernel(%arg0: i32, %arg1: memref<8x1024xf32, #tpu.memory_space<vmem>>, %arg2: memref<1024x128xbf16, #tpu.memory_space<vmem>>, %arg3: memref<1x128xf32, #tpu.memory_space<vmem>>, %arg4: memref<8x128xf32, #tpu.memory_space<vmem>>) attributes {dimension_semantics = [#tpu.dimension_semantics<parallel>], iteration_bounds = array<i64: 1>, scalar_prefetch = 0 : i64, scratch_operands = 0 : i64, tpu.core_type = #tpu.core_type<tc>, window_params = [{transform_indices = @transform_0, window_bounds = array<i64: 8, 1024>}, {pipeline_mode = #tpu.pipeline_mode<synchronous>, transform_indices = @transform_1, window_bounds = array<i64: 1024, 128>}, {pipeline_mode = #tpu.pipeline_mode<synchronous>, transform_indices = @transform_2, window_bounds = array<i64: 1, 128>}, {transform_indices = @transform_3, window_bounds = array<i64: 8, 128>}]} {
    %c0 = arith.constant 0 : index
    %c0_0 = arith.constant 0 : index
    %0 = vector.load %arg1[%c0, %c0_0] : memref<8x1024xf32, #tpu.memory_space<vmem>>, vector<8x1024xf32>
    %1 = arith.truncf %0 : vector<8x1024xf32> to vector<8x1024xbf16>
    %c0_1 = arith.constant 0 : index
    %c0_2 = arith.constant 0 : index
    %2 = vector.load %arg2[%c0_1, %c0_2] : memref<1024x128xbf16, #tpu.memory_space<vmem>>, vector<1024x128xbf16>
    %cst = arith.constant dense<0.000000e+00> : vector<8x128xf32>
    %3 = tpu.matmul %1, %2, %cst {dimension_numbers = #tpu.dot_dimension_numbers<[1], [0], [0], [1], [0, 0, 1, 1], [], []>} : vector<8x1024xbf16>, vector<1024x128xbf16>, vector<8x128xf32> -> vector<8x128xf32>
    %c0_3 = arith.constant 0 : index
    %c0_4 = arith.constant 0 : index
    %4 = vector.load %arg3[%c0_3, %c0_4] : memref<1x128xf32, #tpu.memory_space<vmem>>, vector<1x128xf32>
    %5 = vector.broadcast %4 : vector<1x128xf32> to vector<8x128xf32>
    %6 = arith.addf %3, %5 : vector<8x128xf32>
    %cst_5 = arith.constant 0.000000e+00 : f32
    %7 = vector.broadcast %cst_5 : f32 to vector<8x128xf32>
    %8 = arith.maximumf %6, %7 : vector<8x128xf32>
    %c0_6 = arith.constant 0 : index
    %c0_7 = arith.constant 0 : index
    %9 = vector.load %arg4[%c0_6, %c0_7] : memref<8x128xf32, #tpu.memory_space<vmem>>, vector<8x128xf32>
    tpu.vector_store %arg4[%c0_6, %c0_7], %8 {strides = array<i32>} : memref<8x128xf32, #tpu.memory_space<vmem>>, vector<8x128xf32>,
    return
  }
  func.func @transform_0(%arg0: i32) -> (i32, i32) {
    %c0_i32 = arith.constant 0 : i32
    %c0_i32_0 = arith.constant 0 : i32
    return %arg0, %c0_i32 : i32, i32
  }
  func.func @transform_1(%arg0: i32) -> (i32, i32) {
    %c0_i32 = arith.constant 0 : i32
    %c0_i32_0 = arith.constant 0 : i32
    %c0_i32_1 = arith.constant 0 : i32
    return %c0_i32, %c0_i32_0 : i32, i32
  }
  func.func @transform_2(%arg0: i32) -> (i32, i32) {
    %c0_i32 = arith.constant 0 : i32
    %c0_i32_0 = arith.constant 0 : i32
    %c0_i32_1 = arith.constant 0 : i32
    return %c0_i32, %c0_i32_0 : i32, i32
  }
  func.func @transform_3(%arg0: i32) -> (i32, i32) {
    %c0_i32 = arith.constant 0 : i32
    %c0_i32_0 = arith.constant 0 : i32
    return %arg0, %c0_i32 : i32, i32
  }
}

</mosaic_0001>

<bundles_post_ra>
// kernel: tpu_custom_call.1
= control target key start
LH: loop header
LB: loop body
LE: loop exit
PB: predicated region body
PF: predicated region fallthrough
CT: control target
= control target key end

     0   :  { %8 = vsyncpa [#allocation3], 0  ;;  %s1080_s0 = inlined_call_operand.hbm [shape: f32[8,1024], index: 0, kind: input, shape index: {}]   ;;  %s1081_s1 = inlined_call_operand.hbm [shape: bf16[1024,128], index: 1, kind: input, shape index: {}]   ;;  %s1082_s2 = inlined_call_operand.vmem [shape: f32[1,128], index: 2, kind: input, shape index: {}]   ;;  %s1083_s3 = inlined_call_operand.hbm [shape: f32[8,128], index: 3, kind: output, shape index: {}]  }
   0x1   :  { %9 = vsyncpa [#allocation6], 0 }
   0x2   :  { %10 = vsyncpa [#allocation4], 0  ;;  %s1043_s12 = smov [#allocation2]   ;;  %s1044_s14 = smov [#allocation5]  }
   0x3   :  { %s17_s13 = sshll.u32 %s1043_s12, 4  ;;  %s26_s15 = sshll.u32 %s1044_s14, 4  ;;  %s18_s13 = int_to_ptr.vmem [resolvable:$true] %s17_s13  ;;  %s27_s15 = int_to_ptr.vmem [resolvable:$true] %s26_s15 }
   0x4   :  { %s985_s16 = scalar_lea.vmem %s18_s13, 1024  ;;  %p990_p1 = scmp.lt.s32.totalorder %s18_s13, %s18_s13 }
   0x5   :  { %p986_p0 = scmp.ne.s32.totalorder %s18_s13, %s985_s16  ;;  %p991_p2 = scmp.lt.s32.totalorder %s985_s16, %s985_s16 }
   0x7   :  { %p992_p3 = por %p991_p2, %p990_p1 }
   0x9   :  { %p993_p4 = pnand %p992_p3, %p986_p0 }
   0xb   :  { %996 = shalt.err (!%p993_p4)
}
   0xc   :  { %20 = dma.hbm_to_vmem [thread:$0]  %s1080_s0, 1024, %s18_s13, [#allocation3]  }
   0xd   :  { %s1005_s19 = scalar_lea.vmem %s27_s15, 8192  ;;  %p1010_p6 = scmp.lt.s32.totalorder %s27_s15, %s27_s15 }
   0xe   :  { %p1006_p5 = scmp.ne.s32.totalorder %s27_s15, %s1005_s19  ;;  %p1011_p7 = scmp.lt.s32.totalorder %s1005_s19, %s1005_s19 }
  0x10   :  { %p1012_p8 = por %p1011_p7, %p1010_p6 }
  0x12   :  { %p1013_p9 = pnand %p1012_p8, %p1006_p5 }
  0x14   :  { %1016 = shalt.err (!%p1013_p9)
}
  0x15   :  { %s1045_s20 = smov 64   ;;  %s1046_s21 = smov 4  }
  0x16   :  { %32 = dma.hbm_to_vmem [thread:$0]  %s1081_s1, 8192, %s27_s15, [#allocation6], %s1045_s20, %s1045_s20, %s1046_s21  }
  0x17   :  { %1037 = dma.done.wait [#allocation3], 1024  }
  0x18   :  { %1038 = vsyncadd [#allocation3], 4294966272 }
  0x19   :  { %1039 = dma.done.wait [#allocation6], 8192  }
  0x1a   :  { %1040 = vsyncadd [#allocation6], 4294959104  ;;  %v913_v0 = vld [vmem:[#allocation5 + $0x78] sm:$0xff]   ;;  %v917_v4 = vld [vmem:[#allocation5 + $0x70] sm:$0xff]   ;;  %s1047_s24 = smov [#allocation7]  }
  0x1b   :  { %v914_v1 = vld [vmem:[#allocation5 + $0xf8] sm:$0xff]   ;;  %820 = vmatprep.subr.bf16.mxu0 %v913_v0  ;;  %v918_v5 = vld [vmem:[#allocation5 + $0xf0] sm:$0xff]   ;;  %v921_v8 = vld [vmem:[#allocation5 + $0x68] sm:$0xff]   ;;  %s745_s25 = sshll.u32 %s1047_s24, 4  ;;  %s746_s25 = int_to_ptr.vmem [resolvable:$true] %s745_s25 }
  0x1c   :  { %v915_v2 = vld [vmem:[#allocation5 + $0x38] sm:$0xff]   ;;  %842 = vmatprep.subr.bf16.mxu1 %v914_v1  ;;  %v919_v6 = vld [vmem:[#allocation5 + $0x30] sm:$0xff]   ;;  %v922_v9 = vld [vmem:[#allocation5 + $0xe8] sm:$0xff]   ;;  %p1022_p11 = scmp.lt.s32.totalorder %s746_s25, %s746_s25 }
  0x1d   :  { %v916_v3 = vld [vmem:[#allocation5 + $0xb8] sm:$0xff]   ;;  %821 = vmatpush3.bf16.msra.mxu0 %v915_v2  ;;  %v920_v7 = vld [vmem:[#allocation5 + $0xb0] sm:$0xff]   ;;  %v923_v10 = vld [vmem:[#allocation5 + $0x28] sm:$0xff]  }
  0x1e   :  { %843 = vmatpush3.bf16.msra.mxu1 %v916_v3  ;;  %822 = vmatprep.subr.bf16.mxu0 %v917_v4  ;;  %v924_v11 = vld [vmem:[#allocation5 + $0xa8] sm:$0xff]   ;;  %v925_v12 = vld [vmem:[#allocation5 + $0x60] sm:$0xff]   ;;  %v929_v16 = vld [vmem:[#allocation5 + $0x58] sm:$0xff]  }
  0x1f   :  { %844 = vmatprep.subr.bf16.mxu1 %v918_v5  ;;  %v926_v13 = vld [vmem:[#allocation5 + $0xe0] sm:$0xff]   ;;  %v930_v17 = vld [vmem:[#allocation5 + $0xd8] sm:$0xff]   ;;  %v933_v20 = vld [vmem:[#allocation5 + $0x50] sm:$0xff]  }
  0x20   :  { %v927_v14 = vld [vmem:[#allocation5 + $0x20] sm:$0xff]   ;;  %v931_v18 = vld [vmem:[#allocation5 + $0x18] sm:$0xff]   ;;  %v934_v21 = vld [vmem:[#allocation5 + $0xd0] sm:$0xff]  }
  0x21   :  { %823 = vmatpush3.bf16.msra.mxu0 %v919_v6  ;;  %v928_v15 = vld [vmem:[#allocation5 + $0xa0] sm:$0xff]   ;;  %v932_v19 = vld [vmem:[#allocation5 + $0x98] sm:$0xff]   ;;  %v935_v22 = vld [vmem:[#allocation5 + $0x10] sm:$0xff]  }
  0x22   :  { %845 = vmatpush3.bf16.msra.mxu1 %v920_v7  ;;  %824 = vmatprep.subr.bf16.mxu0 %v921_v8  ;;  %v936_v23 = vld [vmem:[#allocation5 + $0x90] sm:$0xff]   ;;  %v937_v24 = vld [vmem:[#allocation5 + $0x48] sm:$0xff]   ;;  %v941_v28 = vld [vmem:[#allocation5 + $0x40] sm:$0xff]  }
  0x23   :  { %846 = vmatprep.subr.bf16.mxu1 %v922_v9  ;;  %v938_v25 = vld [vmem:[#allocation5 + $0xc8] sm:$0xff]   ;;  %v942_v29 = vld [vmem:[#allocation5 + $0xc0] sm:$0xff]   ;;  %v45_v33 = vld [vmem:[#allocation2 + $0x18] sm:$0xff] }
  0x24   :  { %v939_v26 = vld [vmem:[#allocation5 + $0x8] sm:$0xff]   ;;  %v943_v30 = vld [vmem:[#allocation5] sm:$0xff]   ;;  %v53_v36 = vpack.c.bf16 %v45_v33, %v45_v33  ;;  %v44_v38 = vld [vmem:[#allocation2 + $0x10] sm:$0xff] }
  0x25   :  { %825 = vmatpush3.bf16.msra.mxu0 %v923_v10  ;;  %v940_v27 = vld [vmem:[#allocation5 + $0x88] sm:$0xff]   ;;  %v944_v31 = vld [vmem:[#allocation5 + $0x80] sm:$0xff]   ;;  %v52_v39 = vpack.c.bf16 %v44_v38, %v44_v38  ;;  %v945_v40 = vld [vmem:[#allocation5 + $0x178] sm:$0xff]  }
  0x26   :  { %847 = vmatpush3.bf16.msra.mxu1 %v924_v11  ;;  %826 = vmatprep.subr.bf16.mxu0 %v925_v12  ;;  %v43_v32 = vld [vmem:[#allocation2 + $0x8] sm:$0xff]  ;;  %v42_v34 = vld [vmem:[#allocation2] sm:$0xff]  ;;  %v946_v41 = vld [vmem:[#allocation5 + $0x1f8] sm:$0xff]  }
  0x27   :  { %848 = vmatprep.subr.bf16.mxu1 %v926_v13  ;;  %v51_v35 = vpack.c.bf16 %v43_v32, %v43_v32  ;;  %v50_v37 = vpack.c.bf16 %v42_v34, %v42_v34  ;;  %649 = vmatprep.mubr.bf16.mxu1 %v53_v36  ;;  %v947_v42 = vld [vmem:[#allocation5 + $0x138] sm:$0xff]   ;;  %v949_v44 = vld [vmem:[#allocation5 + $0x170] sm:$0xff]   ;;  %v953_v48 = vld [vmem:[#allocation5 + $0x168] sm:$0xff]  }
  0x28   :  { %v948_v43 = vld [vmem:[#allocation5 + $0x1b8] sm:$0xff]   ;;  %v950_v45 = vld [vmem:[#allocation5 + $0x1f0] sm:$0xff]   ;;  %v954_v49 = vld [vmem:[#allocation5 + $0x1e8] sm:$0xff]  }
  0x29   :  { %827 = vmatpush3.bf16.msra.mxu0 %v927_v14  ;;  %609 = vmatprep.mubr.bf16.mxu0 %v51_v35  ;;  %v951_v46 = vld [vmem:[#allocation5 + $0x130] sm:$0xff]   ;;  %v955_v50 = vld [vmem:[#allocation5 + $0x128] sm:$0xff]   ;;  %v957_v52 = vld [vmem:[#allocation5 + $0x160] sm:$0xff]  }
  0x2a   :  { %849 = vmatpush3.bf16.msra.mxu1 %v928_v15  ;;  %828 = vmatprep.subr.bf16.mxu0 %v929_v16  ;;  %v952_v47 = vld [vmem:[#allocation5 + $0x1b0] sm:$0xff]   ;;  %v956_v51 = vld [vmem:[#allocation5 + $0x1a8] sm:$0xff]   ;;  %v958_v53 = vld [vmem:[#allocation5 + $0x1e0] sm:$0xff]  }
  0x2b   :  { %850 = vmatprep.subr.bf16.mxu1 %v930_v17  ;;  %v959_v54 = vld [vmem:[#allocation5 + $0x120] sm:$0xff]   ;;  %v961_v56 = vld [vmem:[#allocation5 + $0x158] sm:$0xff]   ;;  %v965_v60 = vld [vmem:[#allocation5 + $0x150] sm:$0xff]  }
  0x2c   :  { %v960_v55 = vld [vmem:[#allocation5 + $0x1a0] sm:$0xff]   ;;  %v962_v57 = vld [vmem:[#allocation5 + $0x1d8] sm:$0xff]   ;;  %v966_v61 = vld [vmem:[#allocation5 + $0x1d0] sm:$0xff]  }
  0x2d   :  { %829 = vmatpush3.bf16.msra.mxu0 %v931_v18  ;;  %v963_v58 = vld [vmem:[#allocation5 + $0x118] sm:$0xff]   ;;  %v967_v62 = vld [vmem:[#allocation5 + $0x110] sm:$0xff]   ;;  %v969_v0 = vld [vmem:[#allocation5 + $0x148] sm:$0xff]  }
  0x2e   :  { %851 = vmatpush3.bf16.msra.mxu1 %v932_v19  ;;  %830 = vmatprep.subr.bf16.mxu0 %v933_v20  ;;  %v964_v59 = vld [vmem:[#allocation5 + $0x198] sm:$0xff]   ;;  %v968_v63 = vld [vmem:[#allocation5 + $0x190] sm:$0xff]   ;;  %v970_v1 = vld [vmem:[#allocation5 + $0x1c8] sm:$0xff]  }
  0x2f   :  { %852 = vmatprep.subr.bf16.mxu1 %v934_v21  ;;  %v971_v2 = vld [vmem:[#allocation5 + $0x108] sm:$0xff]   ;;  %v973_v4 = vld [vmem:[#allocation5 + $0x140] sm:$0xff]   ;;  %v49_v9 = vld [vmem:[#allocation2 + $0x38] sm:$0xff] }
  0x30   :  { %v972_v3 = vld [vmem:[#allocation5 + $0x188] sm:$0xff]   ;;  %v974_v5 = vld [vmem:[#allocation5 + $0x1c0] sm:$0xff]   ;;  %v57_v11 = vpack.c.bf16 %v49_v9, %v49_v9  ;;  %v48_v13 = vld [vmem:[#allocation2 + $0x30] sm:$0xff] }
  0x31   :  { %831 = vmatpush3.bf16.msra.mxu0 %v935_v22  ;;  %v975_v6 = vld [vmem:[#allocation5 + $0x100] sm:$0xff]   ;;  %v47_v8 = vld [vmem:[#allocation2 + $0x28] sm:$0xff]  ;;  %v56_v15 = vpack.c.bf16 %v48_v13, %v48_v13 }
  0x32   :  { %853 = vmatpush3.bf16.msra.mxu1 %v936_v23  ;;  %832 = vmatprep.subr.bf16.mxu0 %v937_v24  ;;  %v976_v7 = vld [vmem:[#allocation5 + $0x180] sm:$0xff]   ;;  %v55_v10 = vpack.c.bf16 %v47_v8, %v47_v8 }
  0x33   :  { %854 = vmatprep.subr.bf16.mxu1 %v938_v25  ;;  %v46_v12 = vld [vmem:[#allocation2 + $0x20] sm:$0xff] }
  0x34   :  { %v54_v14 = vpack.c.bf16 %v46_v12, %v46_v12  ;;  %v755_v25 = vld [vmem:[%s1082_s2] ss:$0 sm:$0xff]  ;;  %s1017_s2 = scalar_lea.vmem %s746_s25, 128 }
  0x35   :  { %833 = vmatpush3.bf16.msra.mxu0 %v939_v26  ;;  %p1018_p10 = scmp.ne.s32.totalorder %s746_s25, %s1017_s2  ;;  %p1023_p12 = scmp.lt.s32.totalorder %s1017_s2, %s1017_s2 }
  0x36   :  { %855 = vmatpush3.bf16.msra.mxu1 %v940_v27  ;;  %834 = vmatprep.subr.bf16.mxu0 %v941_v28 }
  0x37   :  { %856 = vmatprep.subr.bf16.mxu1 %v942_v29  ;;  %p1024_p13 = por %p1023_p12, %p1022_p11 }
  0x39   :  { %835 = vmatpush3.bf16.msra.mxu0 %v943_v30  ;;  %p1025_p0 = pnand %p1024_p13, %p1018_p10 }
  0x3a   :  { %857 = vmatpush3.bf16.msra.mxu1 %v944_v31  ;;  %864 = vmatprep.subr.bf16.mxu0 %v945_v40 }
  0x3b   :  { %886 = vmatprep.subr.bf16.mxu1 %v946_v41 }
  0x3c   :  { %610 = vmatmul.mubr.bf16.vlgmr.msra.gmra.mxu0 %v50_v37 }
  0x3d   :  { %650 = vmatmul.mubr.bf16.vlgmr.msra.gmra.mxu1 %v52_v39  ;;  %865 = vmatpush3.bf16.msra.mxu0 %v947_v42 }
  0x3e   :  { %887 = vmatpush3.bf16.msra.mxu1 %v948_v43  ;;  %866 = vmatprep.subr.bf16.mxu0 %v949_v44 }
  0x3f   :  { %888 = vmatprep.subr.bf16.mxu1 %v950_v45  ;;  %689 = vmatprep.mubr.bf16.mxu0 %v55_v10 }
  0x40   :  { %729 = vmatprep.mubr.bf16.mxu1 %v57_v11 }
  0x41   :  { %867 = vmatpush3.bf16.msra.mxu0 %v951_v46 }
  0x42   :  { %889 = vmatpush3.bf16.msra.mxu1 %v952_v47  ;;  %868 = vmatprep.subr.bf16.mxu0 %v953_v48 }
  0x43   :  { %890 = vmatprep.subr.bf16.mxu1 %v954_v49 }
  0x45   :  { %869 = vmatpush3.bf16.msra.mxu0 %v955_v50 }
  0x46   :  { %891 = vmatpush3.bf16.msra.mxu1 %v956_v51  ;;  %870 = vmatprep.subr.bf16.mxu0 %v957_v52 }
  0x47   :  { %892 = vmatprep.subr.bf16.mxu1 %v958_v53 }
  0x49   :  { %871 = vmatpush3.bf16.msra.mxu0 %v959_v54 }
  0x4a   :  { %893 = vmatpush3.bf16.msra.mxu1 %v960_v55  ;;  %872 = vmatprep.subr.bf16.mxu0 %v961_v56 }
  0x4b   :  { %894 = vmatprep.subr.bf16.mxu1 %v962_v57 }
  0x4d   :  { %873 = vmatpush3.bf16.msra.mxu0 %v963_v58 }
  0x4e   :  { %895 = vmatpush3.bf16.msra.mxu1 %v964_v59  ;;  %874 = vmatprep.subr.bf16.mxu0 %v965_v60 }
  0x4f   :  { %896 = vmatprep.subr.bf16.mxu1 %v966_v61 }
  0x51   :  { %875 = vmatpush3.bf16.msra.mxu0 %v967_v62 }
  0x52   :  { %897 = vmatpush3.bf16.msra.mxu1 %v968_v63  ;;  %876 = vmatprep.subr.bf16.mxu0 %v969_v0 }
  0x53   :  { %898 = vmatprep.subr.bf16.mxu1 %v970_v1 }
  0x55   :  { %877 = vmatpush3.bf16.msra.mxu0 %v971_v2 }
  0x56   :  { %899 = vmatpush3.bf16.msra.mxu1 %v972_v3  ;;  %878 = vmatprep.subr.bf16.mxu0 %v973_v4 }
  0x57   :  { %900 = vmatprep.subr.bf16.mxu1 %v974_v5 }
  0x59   :  { %879 = vmatpush3.bf16.msra.mxu0 %v975_v6 }
  0x5a   :  { %901 = vmatpush3.bf16.msra.mxu1 %v976_v7 }
  0x5c   :  { %690 = vmatmul.mubr.bf16.vlgmr.msra.gmra.mxu0 %v54_v14 }
  0x5d   :  { %730 = vmatmul.mubr.bf16.vlgmr.msra.gmra.mxu1 %v56_v15 }
  0xfc   :  { %v836_v16 = vpop.f32.mrf.mxu0 }
  0xfd   :  { %v858_v17 = vpop.f32.mrf.mxu1 }
  0xfe   :  { %v837_v18 = vpop.f32.mrf.mxu0 }
  0xff   :  { %v859_v19 = vpop.f32.mrf.mxu1  ;;  %v838_v24 = vadd.f32 %v837_v18, %v836_v16 }
 0x100   :  { %v839_v20 = vpop.f32.mrf.mxu0  ;;  %v860_v27 = vadd.f32 %v859_v19, %v858_v17 }
 0x101   :  { %v861_v21 = vpop.f32.mrf.mxu1  ;;  %v612_v26 = vadd.f32 %v838_v24, %v755_v25 }
 0x102   :  { %v840_v22 = vpop.f32.mrf.mxu0 }
 0x103   :  { %v862_v23 = vpop.f32.mrf.mxu1  ;;  %v652_v31 = vadd.f32 %v860_v27, %v612_v26 }
 0x11c   :  { %v880_v28 = vpop.f32.mrf.mxu0 }
 0x11d   :  { %v902_v29 = vpop.f32.mrf.mxu1 }
 0x11e   :  { %v881_v30 = vpop.f32.mrf.mxu0 }
 0x11f   :  { %v882_v32 = vadd.f32 %v881_v30, %v880_v28  ;;  %v903_v33 = vpop.f32.mrf.mxu1 }
 0x120   :  { %v883_v34 = vpop.f32.mrf.mxu0  ;;  %v904_v36 = vadd.f32 %v903_v33, %v902_v29 }
 0x121   :  { %v692_v35 = vadd.f32 %v882_v32, %v652_v31  ;;  %v905_v37 = vpop.f32.mrf.mxu1 }
 0x122   :  { %v884_v38 = vpop.f32.mrf.mxu0 }
 0x123   :  { %v732_v39 = vadd.f32 %v904_v36, %v692_v35  ;;  %v906_v40 = vpop.f32.mrf.mxu1 }
 0x125   :  { %v737_v41 = vmax.f32 %v732_v39, 0.0 }
 0x127   :  { %738 = vst [vmem:[#allocation7] sm:$0xff] %v737_v41 }
 0x128   :  { %1028 = shalt.err (!%p1025_p0)
}
 0x129   :  { %748 = dma.vmem_to_hbm [thread:$0]  %s746_s25, 128, %s1083_s3, [#allocation4]  }
 0x12a   :  { %1041 = dma.done.wait [#allocation4], 128  }
 0x12b   :  { %1042 = vsyncadd [#allocation4], 4294967168 }
 0x12c   :  { %752 = vsyncpa [#allocation3], 1 }
 0x12d   :  { %753 = vsyncpa [#allocation6], 1 }
 0x12e   :  { %754 = vsyncpa [#allocation4], 1 }

</bundles_post_ra>
